<compile_context>
chip_gen: v7x
topology: tpu7x:2x2x1
jax: 0.10.0
libtpu: 0.0.40
codegen_flags: <defaults>
</compile_context>

<pallas_src>
import jax
import jax.numpy as jnp
from jax.experimental import pallas as pl
from jax.experimental.pallas import tpu as pltpu

EPS = 1e-5  # nn.GroupNorm default eps


def sa_kernel(x_ref, p_ref, o_ref):
    """One (BT, CT) block.

    x_ref: (BT, 2, CT, hw)   axis 1 = the two channel halves of the full tensor
    p_ref: (CT, 8)           cols = [A0, B0, M0, A1, B1, M1, 0, 0]
    o_ref: (BT, CT, 2*hw)    row ch2 = [out_channel 2*ch2 | out_channel 2*ch2+1]
    """
    hw = x_ref.shape[-1]
    p = p_ref[...].astype(jnp.float32)  # (CT, 8)

    def branch(xs, a, b, m):
        # xs: (BT, CT, hw); a, b, m: (CT, 1) broadcast over batch and lanes.
        mu = jnp.mean(xs, axis=-1, keepdims=True)                     # (BT, CT, 1)
        var = jnp.mean((xs - mu) ** 2, axis=-1, keepdims=True)        # biased, like GN
        xhat = (xs - mu) * jax.lax.rsqrt(var + EPS)
        # GN rows (m==1) gate on the normalized signal; channel rows gate on the mean.
        z = jnp.where(m > 0.5, xhat, mu)
        return xs * jax.nn.sigmoid(a * z + b)

    x0 = x_ref[:, 0].astype(jnp.float32)   # source channels [0, c//2)
    x1 = x_ref[:, 1].astype(jnp.float32)   # source channels [c//2, c)
    # Two lane-aligned dense stores realize channel_shuffle(out, 2) directly.
    o_ref[:, :, :hw] = branch(x0, p[:, 0:1], p[:, 1:2], p[:, 2:3]).astype(o_ref.dtype)
    o_ref[:, :, hw:] = branch(x1, p[:, 3:4], p[:, 4:5], p[:, 5:6]).astype(o_ref.dtype)


def _divisors(n):
    return [d for d in range(1, n + 1) if n % d == 0]


def _pick_tiles(b, c2, hw, itemsize):
    """Pick (BT, CT) so blocks are large but double-buffered VMEM stays ~<=20 MiB."""
    # VMEM/step ~ 2*(BT*2*CT*hw) input + 2*(BT*CT*2*hw) output = 8*BT*CT*hw elements.
    budget_bytes = 20 * 2**20
    row_cap = max(1, budget_bytes // (8 * hw * itemsize))
    # CT must be a multiple of 8 or the full extent (block (8,128) rule on (CT, hw)).
    ct_cands = [d for d in _divisors(c2) if d % 8 == 0] + [c2]
    fitting = [d for d in ct_cands if d <= row_cap]
    ct = max(fitting) if fitting else min(ct_cands)
    bt_cands = [d for d in _divisors(b) if d <= max(1, row_cap // ct)]
    bt = max(bt_cands) if bt_cands else 1
    # Keep at least 2 grid steps when possible so both v7x TensorCores get work.
    if (b // bt) * (c2 // ct) < 2 and bt > 1:
        bt = max(d for d in _divisors(b) if d < bt)
    return bt, ct


def pack_rowparams(cweight, cbias, sweight, sbias, gn_gamma, gn_beta, c, groups):
    """Fuse the per-channel affine params into per-row [A, B, mask] vectors.

    Channel branch (ci <  cg/2): gate = sigmoid(cw*mean + cb)        -> A=cw, B=cb, M=0
    Spatial branch (ci >= cg/2): gate = sigmoid(sw*(g*xhat+beta)+sb) -> A=sw*g, B=sw*beta+sb, M=1
    Rows are ordered by ch2 in [0, c//2); lanes 0-2 = first half source channel
    (ch = ch2), lanes 3-5 = second half source channel (ch = c//2 + ch2).
    """
    c2 = c // 2
    cg = c // groups
    half = cg // 2
    ch = jnp.arange(c)
    ci = ch % cg
    is_gn = ci >= half
    idx = jnp.where(is_gn, ci - half, ci)
    A = jnp.where(is_gn, sweight[idx] * gn_gamma[idx], cweight[idx])
    B = jnp.where(is_gn, sweight[idx] * gn_beta[idx] + sbias[idx], cbias[idx])
    M = is_gn.astype(jnp.float32)
    zeros = jnp.zeros((c2,), jnp.float32)
    cols = [A[:c2], B[:c2], M[:c2], A[c2:], B[c2:], M[c2:], zeros, zeros]
    return jnp.stack(cols, axis=1).astype(jnp.float32)  # (c//2, 8)


def sa_layer_forward(x, rowparams, groups):
    """Pallas implementation of sa_layer.forward (channel_shuffle fused). x: (b,c,h,w)."""
    b, c, h, w = x.shape
    assert c % (2 * groups) == 0, "n_feats must be divisible by 2*groups"
    hw = h * w
    c2 = c // 2
    xr = x.reshape(b, 2, c2, hw)  # metadata-only reshape

    bt, ct = _pick_tiles(b, c2, hw, x.dtype.itemsize)
    grid = (b // bt, c2 // ct)

    out = pl.pallas_call(
        sa_kernel,
        out_shape=jax.ShapeDtypeStruct((b, c2, 2 * hw), x.dtype),
        grid=grid,
        in_specs=[
            pl.BlockSpec((bt, 2, ct, hw), lambda bi, ci: (bi, 0, ci, 0)),
            pl.BlockSpec((ct, 8), lambda bi, ci: (ci, 0)),
        ],
        out_specs=pl.BlockSpec((bt, ct, 2 * hw), lambda bi, ci: (bi, ci, 0)),
        compiler_params=pltpu.CompilerParams(
            dimension_semantics=("parallel", "parallel"),
            vmem_limit_bytes=64 * 1024 * 1024,
        ),
    )(xr, rowparams)

    # Pair rows already hold the shuffled channel order -> free reshape, no transpose.
    return out.reshape(b, c, h, w)


def ref_forward(x, cweight, cbias, sweight, sbias, gn_gamma, gn_beta, groups):
    """Pure-JAX reference reproducing the PyTorch forward (unfused formulation)."""
    b, c, h, w = x.shape
    cg = c // groups
    half = cg // 2
    xg = x.reshape(b * groups, cg, h, w)
    x0, x1 = xg[:, :half], xg[:, half:]
    rs = lambda v: v.reshape(1, half, 1, 1)
    xn = jnp.mean(x0, axis=(2, 3), keepdims=True)
    xn = x0 * jax.nn.sigmoid(rs(cweight) * xn + rs(cbias))
    mu = jnp.mean(x1, axis=(2, 3), keepdims=True)
    var = jnp.mean((x1 - mu) ** 2, axis=(2, 3), keepdims=True)
    xs = (x1 - mu) / jnp.sqrt(var + EPS) * rs(gn_gamma) + rs(gn_beta)
    xs = x1 * jax.nn.sigmoid(rs(sweight) * xs + rs(sbias))
    out = jnp.concatenate([xn, xs], axis=1).reshape(b, c, h, w)
    out = out.reshape(b, 2, c // 2, h, w).transpose(0, 2, 1, 3, 4).reshape(b, c, h, w)
    return out


if __name__ == "__main__":
    n_feats, groups = 8, 2          # n_feats divisible by 2*groups
    b, h, w = 2, 16, 16             # hw = 256 (multiple of 128 -> lane-dense stores)
    half = n_feats // (2 * groups)

    key = jax.random.PRNGKey(0)
    kx, k1, k2, k3, k4, k5, k6 = jax.random.split(key, 7)
    x = jax.random.normal(kx, (b, n_feats, h, w), dtype=jnp.float32)
    # Random parameters (the torch default init zeroes sweight, which would hide
    # GroupNorm-branch bugs); semantics are identical for any parameter values.
    cweight = jax.random.normal(k1, (half,), jnp.float32)
    cbias = jax.random.normal(k2, (half,), jnp.float32)
    sweight = jax.random.normal(k3, (half,), jnp.float32)
    sbias = jax.random.normal(k4, (half,), jnp.float32)
    gn_gamma = jax.random.normal(k5, (half,), jnp.float32) + 1.0
    gn_beta = jax.random.normal(k6, (half,), jnp.float32)

    rowparams = pack_rowparams(cweight, cbias, sweight, sbias, gn_gamma, gn_beta,
                               n_feats, groups)
    out = jax.block_until_ready(sa_layer_forward(x, rowparams, groups))

    ref = ref_forward(x, cweight, cbias, sweight, sbias, gn_gamma, gn_beta, groups)
    assert out.shape == (b, n_feats, h, w), out.shape
    err = float(jnp.max(jnp.abs(out - ref)))
    assert err < 1e-4, err
    print("KERNEL_OK")
</pallas_src>

<mosaic_0001>
module attributes {stable_mosaic.version = 11 : i64} {
  func.func @sa_kernel(%arg0: i32, %arg1: i32, %arg2: memref<1x2x4x256xf32, #tpu.memory_space<vmem>>, %arg3: memref<4x8xf32, #tpu.memory_space<vmem>>, %arg4: memref<1x4x512xf32, #tpu.memory_space<vmem>>) attributes {dimension_semantics = [#tpu.dimension_semantics<parallel>, #tpu.dimension_semantics<parallel>], iteration_bounds = array<i64: 2, 1>, scalar_prefetch = 0 : i64, scratch_operands = 0 : i64, tpu.core_type = #tpu.core_type<tc>, window_params = [{transform_indices = @transform_0, window_bounds = array<i64: 1, 2, 4, 256>}, {transform_indices = @transform_1, window_bounds = array<i64: 4, 8>}, {transform_indices = @transform_2, window_bounds = array<i64: 1, 4, 512>}]} {
    %c0 = arith.constant 0 : index
    %c0_0 = arith.constant 0 : index
    %0 = vector.load %arg3[%c0, %c0_0] : memref<4x8xf32, #tpu.memory_space<vmem>>, vector<4x8xf32>
    %c0_1 = arith.constant 0 : index
    %c0_2 = arith.constant 0 : index
    %c0_3 = arith.constant 0 : index
    %c0_4 = arith.constant 0 : index
    %1 = vector.load %arg2[%c0_1, %c0_2, %c0_3, %c0_4] : memref<1x2x4x256xf32, #tpu.memory_space<vmem>>, vector<1x1x4x256xf32>
    %2 = vector.shape_cast %1 : vector<1x1x4x256xf32> to vector<1x4x256xf32>
    %c0_5 = arith.constant 0 : index
    %c1 = arith.constant 1 : index
    %c0_6 = arith.constant 0 : index
    %c0_7 = arith.constant 0 : index
    %3 = vector.load %arg2[%c0_5, %c1, %c0_6, %c0_7] : memref<1x2x4x256xf32, #tpu.memory_space<vmem>>, vector<1x1x4x256xf32>
    %4 = vector.shape_cast %3 : vector<1x1x4x256xf32> to vector<1x4x256xf32>
    %5 = vector.extract_strided_slice %0 {offsets = [0, 0], sizes = [4, 1], strides = [1, 1]} : vector<4x8xf32> to vector<4x1xf32>
    %6 = vector.extract_strided_slice %0 {offsets = [0, 1], sizes = [4, 1], strides = [1, 1]} : vector<4x8xf32> to vector<4x1xf32>
    %7 = vector.extract_strided_slice %0 {offsets = [0, 2], sizes = [4, 1], strides = [1, 1]} : vector<4x8xf32> to vector<4x1xf32>
    %cst = arith.constant dense<0.000000e+00> : vector<1x4xf32>
    %8 = vector.multi_reduction <add>, %2, %cst [2] : vector<1x4x256xf32> to vector<1x4xf32>
    %9 = vector.shape_cast %8 : vector<1x4xf32> to vector<1x4x1xf32>
    %cst_8 = arith.constant 2.560000e+02 : f32
    %10 = vector.broadcast %cst_8 : f32 to vector<1x4x1xf32>
    %11 = arith.divf %9, %10 : vector<1x4x1xf32>
    %12 = vector.broadcast %11 : vector<1x4x1xf32> to vector<1x4x256xf32>
    %13 = arith.subf %2, %12 : vector<1x4x256xf32>
    %14 = arith.mulf %13, %13 : vector<1x4x256xf32>
    %cst_9 = arith.constant dense<0.000000e+00> : vector<1x4xf32>
    %15 = vector.multi_reduction <add>, %14, %cst_9 [2] : vector<1x4x256xf32> to vector<1x4xf32>
    %16 = vector.shape_cast %15 : vector<1x4xf32> to vector<1x4x1xf32>
    %cst_10 = arith.constant 2.560000e+02 : f32
    %17 = vector.broadcast %cst_10 : f32 to vector<1x4x1xf32>
    %18 = arith.divf %16, %17 : vector<1x4x1xf32>
    %19 = vector.broadcast %11 : vector<1x4x1xf32> to vector<1x4x256xf32>
    %20 = arith.subf %2, %19 : vector<1x4x256xf32>
    %cst_11 = arith.constant 9.99999974E-6 : f32
    %21 = vector.broadcast %cst_11 : f32 to vector<1x4x1xf32>
    %22 = arith.addf %18, %21 : vector<1x4x1xf32>
    %23 = math.rsqrt %22 : vector<1x4x1xf32>
    %24 = vector.broadcast %23 : vector<1x4x1xf32> to vector<1x4x256xf32>
    %25 = arith.mulf %20, %24 : vector<1x4x256xf32>
    %cst_12 = arith.constant 5.000000e-01 : f32
    %26 = vector.broadcast %cst_12 : f32 to vector<4x1xf32>
    %27 = arith.cmpf ogt, %7, %26 : vector<4x1xf32>
    %28 = vector.shape_cast %27 : vector<4x1xi1> to vector<1x4x1xi1>
    %29 = vector.broadcast %28 : vector<1x4x1xi1> to vector<1x4x256xi1>
    %30 = vector.shape_cast %11 : vector<1x4x1xf32> to vector<1x4x1xf32>
    %31 = vector.broadcast %30 : vector<1x4x1xf32> to vector<1x4x256xf32>
    %32 = arith.select %29, %25, %31 : vector<1x4x256xi1>, vector<1x4x256xf32>
    %33 = vector.shape_cast %5 : vector<4x1xf32> to vector<1x4x1xf32>
    %34 = vector.broadcast %33 : vector<1x4x1xf32> to vector<1x4x256xf32>
    %35 = arith.mulf %34, %32 : vector<1x4x256xf32>
    %36 = vector.shape_cast %6 : vector<4x1xf32> to vector<1x4x1xf32>
    %37 = vector.broadcast %36 : vector<1x4x1xf32> to vector<1x4x256xf32>
    %38 = arith.addf %35, %37 : vector<1x4x256xf32>
    %39 = arith.negf %38 : vector<1x4x256xf32>
    %40 = math.exp %39 : vector<1x4x256xf32>
    %cst_13 = arith.constant 1.000000e+00 : f32
    %41 = vector.broadcast %cst_13 : f32 to vector<1x4x256xf32>
    %42 = arith.addf %41, %40 : vector<1x4x256xf32>
    %43 = arith.divf %41, %42 : vector<1x4x256xf32>
    %44 = arith.mulf %2, %43 : vector<1x4x256xf32>
    %c0_14 = arith.constant 0 : index
    %c0_15 = arith.constant 0 : index
    %c0_16 = arith.constant 0 : index
    %45 = vector.load %arg4[%c0_14, %c0_15, %c0_16] : memref<1x4x512xf32, #tpu.memory_space<vmem>>, vector<1x4x256xf32>
    tpu.vector_store %arg4[%c0_14, %c0_15, %c0_16], %44 {strides = array<i32>} : memref<1x4x512xf32, #tpu.memory_space<vmem>>, vector<1x4x256xf32>,
    %46 = vector.extract_strided_slice %0 {offsets = [0, 3], sizes = [4, 1], strides = [1, 1]} : vector<4x8xf32> to vector<4x1xf32>
    %47 = vector.extract_strided_slice %0 {offsets = [0, 4], sizes = [4, 1], strides = [1, 1]} : vector<4x8xf32> to vector<4x1xf32>
    %48 = vector.extract_strided_slice %0 {offsets = [0, 5], sizes = [4, 1], strides = [1, 1]} : vector<4x8xf32> to vector<4x1xf32>
    %cst_17 = arith.constant dense<0.000000e+00> : vector<1x4xf32>
    %49 = vector.multi_reduction <add>, %4, %cst_17 [2] : vector<1x4x256xf32> to vector<1x4xf32>
    %50 = vector.shape_cast %49 : vector<1x4xf32> to vector<1x4x1xf32>
    %cst_18 = arith.constant 2.560000e+02 : f32
    %51 = vector.broadcast %cst_18 : f32 to vector<1x4x1xf32>
    %52 = arith.divf %50, %51 : vector<1x4x1xf32>
    %53 = vector.broadcast %52 : vector<1x4x1xf32> to vector<1x4x256xf32>
    %54 = arith.subf %4, %53 : vector<1x4x256xf32>
    %55 = arith.mulf %54, %54 : vector<1x4x256xf32>
    %cst_19 = arith.constant dense<0.000000e+00> : vector<1x4xf32>
    %56 = vector.multi_reduction <add>, %55, %cst_19 [2] : vector<1x4x256xf32> to vector<1x4xf32>
    %57 = vector.shape_cast %56 : vector<1x4xf32> to vector<1x4x1xf32>
    %cst_20 = arith.constant 2.560000e+02 : f32
    %58 = vector.broadcast %cst_20 : f32 to vector<1x4x1xf32>
    %59 = arith.divf %57, %58 : vector<1x4x1xf32>
    %60 = vector.broadcast %52 : vector<1x4x1xf32> to vector<1x4x256xf32>
    %61 = arith.subf %4, %60 : vector<1x4x256xf32>
    %cst_21 = arith.constant 9.99999974E-6 : f32
    %62 = vector.broadcast %cst_21 : f32 to vector<1x4x1xf32>
    %63 = arith.addf %59, %62 : vector<1x4x1xf32>
    %64 = math.rsqrt %63 : vector<1x4x1xf32>
    %65 = vector.broadcast %64 : vector<1x4x1xf32> to vector<1x4x256xf32>
    %66 = arith.mulf %61, %65 : vector<1x4x256xf32>
    %cst_22 = arith.constant 5.000000e-01 : f32
    %67 = vector.broadcast %cst_22 : f32 to vector<4x1xf32>
    %68 = arith.cmpf ogt, %48, %67 : vector<4x1xf32>
    %69 = vector.shape_cast %68 : vector<4x1xi1> to vector<1x4x1xi1>
    %70 = vector.broadcast %69 : vector<1x4x1xi1> to vector<1x4x256xi1>
    %71 = vector.shape_cast %52 : vector<1x4x1xf32> to vector<1x4x1xf32>
    %72 = vector.broadcast %71 : vector<1x4x1xf32> to vector<1x4x256xf32>
    %73 = arith.select %70, %66, %72 : vector<1x4x256xi1>, vector<1x4x256xf32>
    %74 = vector.shape_cast %46 : vector<4x1xf32> to vector<1x4x1xf32>
    %75 = vector.broadcast %74 : vector<1x4x1xf32> to vector<1x4x256xf32>
    %76 = arith.mulf %75, %73 : vector<1x4x256xf32>
    %77 = vector.shape_cast %47 : vector<4x1xf32> to vector<1x4x1xf32>
    %78 = vector.broadcast %77 : vector<1x4x1xf32> to vector<1x4x256xf32>
    %79 = arith.addf %76, %78 : vector<1x4x256xf32>
    %80 = arith.negf %79 : vector<1x4x256xf32>
    %81 = math.exp %80 : vector<1x4x256xf32>
    %cst_23 = arith.constant 1.000000e+00 : f32
    %82 = vector.broadcast %cst_23 : f32 to vector<1x4x256xf32>
    %83 = arith.addf %82, %81 : vector<1x4x256xf32>
    %84 = arith.divf %82, %83 : vector<1x4x256xf32>
    %85 = arith.mulf %4, %84 : vector<1x4x256xf32>
    %c0_24 = arith.constant 0 : index
    %c0_25 = arith.constant 0 : index
    %c256 = arith.constant 256 : index
    %86 = vector.load %arg4[%c0_24, %c0_25, %c256] : memref<1x4x512xf32, #tpu.memory_space<vmem>>, vector<1x4x256xf32>
    tpu.vector_store %arg4[%c0_24, %c0_25, %c256], %85 {strides = array<i32>} : memref<1x4x512xf32, #tpu.memory_space<vmem>>, vector<1x4x256xf32>,
    return
  }
  func.func @transform_0(%arg0: i32, %arg1: i32) -> (i32, i32, i32, i32) {
    %c0_i32 = arith.constant 0 : i32
    %c0_i32_0 = arith.constant 0 : i32
    %c0_i32_1 = arith.constant 0 : i32
    return %arg0, %c0_i32, %arg1, %c0_i32_0 : i32, i32, i32, i32
  }
  func.func @transform_1(%arg0: i32, %arg1: i32) -> (i32, i32) {
    %c0_i32 = arith.constant 0 : i32
    %c0_i32_0 = arith.constant 0 : i32
    return %arg1, %c0_i32 : i32, i32
  }
  func.func @transform_2(%arg0: i32, %arg1: i32) -> (i32, i32, i32) {
    %c0_i32 = arith.constant 0 : i32
    %c0_i32_0 = arith.constant 0 : i32
    return %arg0, %arg1, %c0_i32 : i32, i32, i32
  }
}

</mosaic_0001>

<bundles_post_ra>
// kernel: tpu_custom_call.1
= control target key start
LH: loop header
LB: loop body
LE: loop exit
PB: predicated region body
PF: predicated region fallthrough
CT: control target
= control target key end

     0   :  { %7 = vsyncpa [#allocation3], 0  ;;  %s1035_s0 = inlined_call_operand.hbm [shape: f32[2,2,4,256], index: 0, kind: input, shape index: {}]   ;;  %s1036_s1 = inlined_call_operand.hbm [shape: f32[4,8], index: 1, kind: input, shape index: {}]   ;;  %s1037_s2 = inlined_call_operand.hbm [shape: f32[2,4,512], index: 2, kind: output, shape index: {}]  }
   0x1   :  { %9 = vsyncpa [#allocation3 + $0x1], 0 }
   0x2   :  { %10 = vsyncpa [#allocation6], 0 }
   0x3   :  { %11 = vsyncpa [#allocation4], 0 }
   0x4   :  { %13 = vsyncpa [#allocation4 + $0x1], 0  ;;  %s790_s9 = smov 0   ;;  %s792_s10 = smov 0  }
   0x5   :  { %s794_s11 = smov 0   ;;  %s796_s12 = smov 0  }
   0x6   :  { %s798_s13 = smov 0   ;;  %s800_s14 = smov 0  }
   0x7 LB: > { %s482_s15 = sadd.s32 4294967295, %s761_s14   ;;  %s483_s16 = sadd.s32 4294967294, %s761_s14   ;;  %s761_s14 = sphi %s800_s14, %s19_s14   ;;  %s757_s13 = sphi %s798_s13, %s1065_s13   ;;  %s753_s12 = sphi %s796_s12, %s1064_s12   ;;  %s749_s11 = sphi %s794_s11, %s1063_s11   ;;  %s745_s10 = sphi %s792_s10, %s1062_s10   ;;  %s741_s9 = sphi %s790_s9, %s1061_s9  }
   0x8   : > { %s40_s17 = sadd.s32 1, %s749_s11  ;;  %p47_p0 = scmp.ne.s32.totalorder %s749_s11, %s745_s10 }
   0x9   : > { %p48_p1 = scmp.eq.s32.totalorder %s761_s14, 0  ;;  %p53_p2 = scmp.ne.s32.totalorder %s745_s10, %s741_s9 }
   0xa   : > { %p828_p3 = scmp.eq.s32.totalorder %s482_s15, 0  ;;  %p105_p4 = scmp.eq.s32.totalorder %s482_s15, 1 }
   0xb   : > { %p832_p5 = por %p48_p1, %p47_p0  ;;  %p111_p6 = scmp.eq.s32.totalorder %s483_s16, 1 }
   0xc   : > { %s1044_s18 = scalar_select %p828_p3, 1, 0 }
   0xd   : > { %p838_p7 = por %p828_p3, %p53_p2  ;;  %p842_p8 = por %p105_p4, %p47_p0 }
   0xe   : > { %p846_p9 = por %p111_p6, %p53_p2  ;;  %p484_p10 = scmp.ge.s32.totalorder %s761_s14, 1 }
   0xf   : > { %s1046_s20 = scalar_select %p838_p7, 1, 0 }
  0x10   : > { %s1047_s21 = scalar_select %p842_p8, 1, 0 }
  0x11   : > { %s1048_s22 = scalar_select %p846_p9, 1, 0 }
  0x12   : > { %p118_p11 = scmp.lt.s32.totalorder %s761_s14, 3  ;;  %s763_s24 = smov [#allocation5]  }
  0x13   : > { %s133_s25 = sshll.u32 %s763_s24, 4  ;;  %p527_p1 = scmp.lt.s32.totalorder %s761_s14, 2  ;;  %s134_s25 = int_to_ptr.vmem [resolvable:$true] %s133_s25 }
  0x14   : > { %p853_p13 = pnand %p484_p10, %p118_p11  ;;  %s31_s28 = sadd.s32 1, %s757_s13 }
  0x15   : > { %p862_p4 = pnand %p527_p1, %p832_p5  ;;  %p873_p6 = scmp.ge.s32.totalorder %s31_s28, 2 }
  0x16   : > { %s1049_s23 = scalar_select %p853_p13, 1, 0 }
  0x17   : > { %p514_p0 = pneg %p853_p13  ;;  %s144_s30 = sand.u32 1, %s749_s11  }
  0x18   : > { %s1050_s26 = scalar_select %p862_p4, 1, 0 }
  0x19   : > { %p868_p2 = pnand %p514_p0, %p828_p3  ;;  %s617_s5 = scalar_lea.hbm %s1036_s1, 64 }
  0x1a   : > { %s1052_s29 = scalar_select %p873_p6, 1, 0 }
  0x1b   : > { %p618_p5 = scmp.ne.s32.totalorder %s1036_s1, %s617_s5  ;;  %p619_p10 = pneg %p868_p2 }
  0x1c   : > { %p624_p0 = scmp.lt.u32.totalorder %s617_s5, %s1036_s1 }
  0x1d   : > { %p620_p11 = pnand %p619_p10, %p618_p5 }
  0x1f   : > { %p621_p1 = pneg %p620_p11 }
  0x21   : > { %p626_p12 = pnand %p624_p0, %p621_p1 }
  0x23   : > { %629 = shalt.err (!%p626_p12)
}
  0x24   : > { %s630_s16 = scalar_lea.vmem %s134_s25, 64  ;;  %p638_p7 = scmp.lt.s32.totalorder %s134_s25, %s134_s25 }
  0x25   : > { %p631_p9 = scmp.ne.s32.totalorder %s134_s25, %s630_s16  ;;  %p639_p13 = scmp.lt.s32.totalorder %s630_s16, %s630_s16 }
  0x27   : > { %p633_p8 = pnand %p631_p9, %p619_p10  ;;  %p640_p4 = por %p639_p13, %p638_p7 }
  0x29   : > { %p634_p3 = pneg %p633_p8 }
  0x2b   : > { %p641_p6 = pnand %p640_p4, %p634_p3 }
  0x2d   : > { %644 = shalt.err (!%p641_p6)
}
  0x2e   : > { %517 = dma.hbm_to_vmem [thread:$0]  (!%p868_p2), %s1036_s1, 64, %s134_s25, [#allocation6]  }
  0x2f   : > { %p1053_p9 = scmp.ne.s32.totalorder %s1052_s29, 0  ;;  %s487_s3 = sshll.u32 %s144_s30, 4 }
  0x30   : > { %s504_s5 = sshll.u32 %s757_s13, 8  ;;  %s148_s8 = scalar_lea.vmem [#allocation2], %s487_s3 }
  0x31   : > { %s1067_s28 = smov (%p1053_p9, %s31_s28), 0  ;;  %s904_s7 = scalar_lea.hbm %s1035_s0, %s504_s5 }
  0x32   : > { %s35_s4 = ssub.s32 %s757_s13, %s1067_s28  ;;  %s157_s15 = sshll.u32 %s148_s8, 4  ;;  %s911_s15 = int_to_ptr.vmem [resolvable:$true] %s157_s15 }
  0x33   : > { %p38_p3 = scmp.eq.s32.totalorder %s35_s4, 0  ;;  %s913_s29 = scalar_lea.sflag [#allocation3], %s144_s30 }
  0x34   : > { %s645_s16 = scalar_lea.hbm %s904_s7, 256  ;;  %p1054_p8 = scmp.ne.s32.totalorder %s1050_s26, 0 }
  0x35   : > { %s909_s25 = scalar_select %p38_p3, %s749_s11, %s40_s17  }
  0x36   : > { %p646_p7 = scmp.ne.s32.totalorder %s904_s7, %s645_s16  ;;  %p647_p12 = pneg %p1054_p8 }
  0x37   : > { %s650_s3 = scalar_lea.hbm %s1035_s0, 512  ;;  %p651_p2 = scmp.lt.u32.totalorder %s904_s7, %s1035_s0 }
  0x38   : > { %p648_p13 = pnand %p647_p12, %p646_p7  ;;  %p652_p6 = scmp.lt.u32.totalorder %s650_s3, %s645_s16 }
  0x39   : > { %p654_p10 = scmp.lt.u32.totalorder %s645_s16, %s904_s7 }
  0x3a   : > { %p649_p4 = pneg %p648_p13  ;;  %p653_p5 = por %p652_p6, %p651_p2 }
  0x3c   : > { %p655_p11 = por %p654_p10, %p653_p5 }
  0x3e   : > { %p656_p1 = pnand %p655_p11, %p649_p4 }
  0x40   : > { %659 = shalt.err (!%p656_p1)
}
  0x41   : > { %s660_s17 = scalar_lea.vmem %s911_s15, 256  ;;  %s764_s30 = smov [#allocation2]  }
  0x42   : > { %p661_p0 = scmp.ne.s32.totalorder %s911_s15, %s660_s17  ;;  %s665_s27 = sshll.u32 %s764_s30, 4  ;;  %s666_s27 = int_to_ptr.vmem [resolvable:$false] %s665_s27 }
  0x43   : > { %s667_s6 = scalar_lea.vmem %s666_s27, 512  ;;  %p668_p7 = scmp.lt.s32.totalorder %s911_s15, %s666_s27 }
  0x44   : > { %p663_p9 = pnand %p661_p0, %p647_p12  ;;  %p669_p13 = scmp.lt.s32.totalorder %s667_s6, %s660_s17 }
  0x46   : > { %p664_p3 = pneg %p663_p9  ;;  %p670_p2 = por %p669_p13, %p668_p7 }
  0x48   : > { %p671_p6 = pnand %p670_p2, %p664_p3 }
  0x4a   : > { %674 = shalt.err (!%p671_p6)
}
  0x4b   : > { %s765_s8 = smov 128   ;;  %s766_s16 = smov 8  }
  0x4c   : > { %521 = dma.hbm_to_vmem [thread:$0]  (!%p1054_p8), %s904_s7, 256, %s911_s15, %s913_s29, %s765_s8, %s765_s8, %s766_s16  }
  0x4d   : > { %p1055_p12 = scmp.ne.s32.totalorder %s1049_s23, 0 }
  0x4e   : > { %s944_s19 = sand.u32 (!%p1055_p12), 1, %s745_s10   ;;  %p1056_p4 = scmp.ne.s32.totalorder (!%p1055_p12), %s1046_s20, 0 }
  0x4f   : > { %169 = sbr.rel (%p1055_p12) target bundleno = 467 (0x1d3), region = 28  ;;  %s491_s24 = sshll.u32 (!%p1055_p12), %s944_s19, 4 }
  0x50   : > { %s172_s3 = scalar_lea.sflag (!%p1055_p12), [#allocation3], %s944_s19  ;;  %s175_s4 = scalar_lea.vmem (!%p1055_p12), [#allocation2], %s491_s24 }
  0x56   : > { %728 = dma.done.wait (%p1056_p4), %s172_s3, 256  }
  0x57   : > { %730 = vsyncadd (%p1056_p4), %s172_s3, 4294967040  ;;  %p1057_p8 = scmp.ne.s32.totalorder %s1044_s18, 0 }
  0x59   : > { %732 = dma.done.wait (%p1057_p8), [#allocation6], 64  }
  0x5a   : > { %734 = vsyncadd (%p1057_p8), [#allocation6], 4294967232  ;;  %v767_v0 = vmov 5   ;;  %vm207_vm0 = vcmask 1043456   ;;  %v958_v1 = vld [vmem:[%s175_s4] sm:$0xff]  ;;  %v960_v2 = vld [vmem:[%s175_s4 + $0x8] sm:$0xff]  ;;  %v219_v20 = vlaneseq }
  0x5b   : > { %589 = vset.pattern.permute.xlu1 %v767_v0  ;;  %v200_v3 = vld [vmem:[#allocation5] sm:$0xf]  ;;  %v205_v4 = vcombine.high %v958_v1, %v958_v1  ;;  %v208_v5 = vsel %vm207_vm0, %v958_v1, 0.0  ;;  %v290_v6 = vcombine.high %v960_v2, %v960_v2  ;;  %v292_v8 = vsel %vm207_vm0, %v960_v2, 0.0  ;;  %s505_s18 = sshll.u32 %s753_s12, 8  ;;  %s199_s20 = scalar_lea.vmem [#allocation7], %s491_s24 }
  0x5c   : > { %vm247_vm1 = vcmp.gt.f32.partialorder %v200_v3, 0.5  ;;  %v768_v10 = vmov 0   ;;  %v769_v14 = vmov 3   ;;  %v770_v15 = vmov 1   ;;  %s386_s23 = sshll.u32 %s199_s20, 4  ;;  %s986_s15 = scalar_lea.hbm %s1037_s2, %s505_s18  ;;  %s988_s23 = int_to_ptr.vmem [resolvable:$true] %s386_s23 }
  0x5d   : > { %v209_v7 = vsel %vm207_vm0, %v205_v4, 0.0  ;;  %v293_v9 = vsel %vm207_vm0, %v290_v6, 0.0  ;;  %v248_v11 = vsel %vm247_vm1, 1, %v768_v10  ;;  %v771_v16 = vmov 2   ;;  %s370_s29 = scalar_lea.sflag [#allocation4], %s944_s19  ;;  %s675_s12 = scalar_lea.vmem %s988_s23, 256 }
  0x5e   : > { %v210_v12 = vadd.f32 %v209_v7, %v208_v5  ;;  %331 = vperm.xlu1 %589, %v248_v11   ;;  %v294_v13 = vadd.f32 %v293_v9, %v292_v8  ;;  %588 = vset.pattern.permute.xlu0 %v771_v16  ;;  %v772_v17 = vmov 4   ;;  %v773_v18 = vmov 839922192   ;;  %p676_p5 = scmp.ne.s32.totalorder %s988_s23, %s675_s12  ;;  %p1058_p10 = scmp.ne.s32.totalorder %s1047_s21, 0 }
  0x5f   : > { %v217_v19 = vunpack.c.l.s4 %v773_v18  ;;  %v220_v22 = vshrl.u32 %v219_v20, 7  ;;  %s774_s5 = smov [#allocation7]  }
  0x60   : > { %211 = vadd.xlane.f32.xlu0 %v210_v12  ;;  %p677_p11 = pnand %p676_p5, %p1058_p10  ;;  %s679_s17 = sshll.u32 %s774_s5, 4  ;;  %s680_s17 = int_to_ptr.vmem [resolvable:$false] %s679_s17 }
  0x61   : > { %v218_v21 = vunpack.c.0.s8 %v217_v19  ;;  %s681_s30 = scalar_lea.vmem %s680_s17, 512  ;;  %p682_p0 = scmp.lt.s32.totalorder %s988_s23, %s680_s17 }
  0x62   : > { %590 = vset.pattern.permute.xlu1 %v768_v10  ;;  %p678_p1 = pneg %p677_p11  ;;  %p683_p9 = scmp.lt.s32.totalorder %s681_s30, %s675_s12 }
  0x63   : > { %260 = vperm.xlu1 %590, %v200_v3   ;;  %v221_v23 = vsub.s32 %v218_v21, %v220_v22 }
  0x64   : > { %295 = vadd.xlane.f32.xlu0 %v294_v13  ;;  %p684_p3 = por %p683_p9, %p682_p0 }
  0x66   : > { %p685_p7 = pnand %p684_p3, %p678_p1 }
  0x67   : > { %591 = vset.pattern.permute.xlu1 %v769_v14 }
  0x68   : > { %340 = vperm.xlu1 %591, %v200_v3  }
  0x6c   : > { %592 = vset.pattern.permute.xlu1 %v770_v15 }
  0x6d   : > { %266 = vperm.xlu1 %592, %v200_v3  }
  0x71   : > { %593 = vset.pattern.permute.xlu1 %v772_v17 }
  0x7a   : > { %250 = vperm.xlu0 %588, %v248_v11  }
  0x7e   : > { %594 = vset.pattern.permute.xlu0 %v772_v17 }
  0xdd   : > { %v332_v42 = vpop.permute.xlu1 %331 }
  0xde   : > { %vm333_vm3 = vcmp.eq.s32.totalorder %v332_v42, 1 }
  0xe2   : > { %v261_v43 = vpop.permute.xlu1 %260 }
  0xe7   : > { %v341_v44 = vpop.permute.xlu1 %340 }
  0xec   : > { %v267_v45 = vpop.permute.xlu1 %266 }
  0xed   : > { %v212_v24 = vpop.xlane.xlu0 %211 }
  0xee   : > { %v214_v25 = vmul.f32 0.00390625, %v212_v24 }
  0xf0   : > { %v222_v26 = vrot.slane %v214_v25, %v221_v23 }
  0xf1   : > { %v296_v27 = vpop.xlane.xlu0 %295 }
  0xf2   : > { %v297_v28 = vmul.f32 0.00390625, %v296_v27  ;;  %v224_v29 = vsub.f32 %v958_v1, %v222_v26 }
  0xf4   : > { %v305_v30 = vrot.slane %v297_v28, %v221_v23  ;;  %v225_v31 = vmul.f32 %v224_v29, %v224_v29 }
  0xf6   : > { %v227_v32 = vcombine.high %v225_v31, %v225_v31  ;;  %v307_v33 = vsub.f32 %v960_v2, %v305_v30  ;;  %v229_v34 = vsel %vm207_vm0, %v225_v31, 0.0 }
  0xf8   : > { %v230_v35 = vsel %vm207_vm0, %v227_v32, 0.0  ;;  %v308_v36 = vmul.f32 %v307_v33, %v307_v33 }
  0xf9   : > { %v231_v37 = vadd.f32 %v230_v35, %v229_v34  ;;  %v251_v52 = vpop.permute.xlu0 %250 }
  0xfa   : > { %v310_v38 = vcombine.high %v308_v36, %v308_v36  ;;  %v312_v39 = vsel %vm207_vm0, %v308_v36, 0.0  ;;  %vm252_vm2 = vcmp.eq.s32.totalorder %v251_v52, 1 }
  0xfb   : > { %232 = vadd.xlane.f32.xlu1 %v231_v37 }
  0xfc   : > { %v313_v40 = vsel %vm207_vm0, %v310_v38, 0.0 }
  0xfd   : > { %v314_v41 = vadd.f32 %v313_v40, %v312_v39 }
  0xff   : > { %315 = vadd.xlane.f32.xlu1 %v314_v41 }
 0x110   : > { %346 = vperm.xlu1 %593, %v200_v3  }
 0x188   : > { %v233_v46 = vpop.xlane.xlu1 %232 }
 0x189   : > { %v234_v47 = vmul.f32 0.00390625, %v233_v46 }
 0x18b   : > { %v235_v48 = vadd.f32 1e-05, %v234_v47 }
 0x18c   : > { %v316_v49 = vpop.xlane.xlu1 %315 }
 0x18d   : > { %597 = vrsqrt.f32 %v235_v48  ;;  %v317_v50 = vmul.f32 0.00390625, %v316_v49 }
 0x18f   : > { %v318_v51 = vadd.f32 1e-05, %v317_v50 }
 0x190   : > { %v347_v5 = vpop.permute.xlu1 %346 }
 0x191   : > { %599 = vrsqrt.f32 %v318_v51 }
 0x197   : > { %v598_v53 = vpop.eup %597 }
 0x198   : > { %v244_v54 = vrot.slane %v598_v53, %v221_v23 }
 0x19a   : > { %v246_v55 = vmul.f32 %v244_v54, %v224_v29 }
 0x19b   : > { %v600_v56 = vpop.eup %599 }
 0x19c   : > { %v254_v57 = vcombine.high %v246_v55, %v246_v55  ;;  %v256_v58 = vsel %vm252_vm2, %v246_v55, %v214_v25  ;;  %v327_v59 = vrot.slane %v600_v56, %v221_v23 }
 0x19d   : > { %v263_v60 = vmul.f32 %v261_v43, %v256_v58 }
 0x19e   : > { %v257_v61 = vsel %vm252_vm2, %v254_v57, %v214_v25  ;;  %v329_v62 = vmul.f32 %v327_v59, %v307_v33 }
 0x19f   : > { %v264_v63 = vmul.f32 %v261_v43, %v257_v61  ;;  %v269_v0 = vadd.f32 %v267_v45, %v263_v60 }
 0x1a0   : > { %v335_v3 = vcombine.high %v329_v62, %v329_v62  ;;  %v337_v4 = vsel %vm333_vm3, %v329_v62, %v297_v28 }
 0x1a1   : > { %v270_v6 = vadd.f32 %v267_v45, %v264_v63  ;;  %v495_v7 = vmul.f32 -1.442695, %v269_v0  ;;  %v343_v8 = vmul.f32 %v341_v44, %v337_v4 }
 0x1a2   : > { %v338_v9 = vsel %vm333_vm3, %v335_v3, %v297_v28 }
 0x1a3   : > { %601 = vpow2.f32 %v495_v7  ;;  %v496_v10 = vmul.f32 -1.442695, %v270_v6  ;;  %v344_v11 = vmul.f32 %v341_v44, %v338_v9  ;;  %v349_v12 = vadd.f32 %v347_v5, %v343_v8 }
 0x1a5   : > { %603 = vpow2.f32 %v496_v10  ;;  %v350_v13 = vadd.f32 %v347_v5, %v344_v11  ;;  %v497_v14 = vmul.f32 -1.442695, %v349_v12 }
 0x1a7   : > { %605 = vpow2.f32 %v497_v14  ;;  %v498_v15 = vmul.f32 -1.442695, %v350_v13 }
 0x1a9   : > { %607 = vpow2.f32 %v498_v15 }
 0x1ad   : > { %v602_v16 = vpop.eup %601 }
 0x1ae   : > { %v277_v17 = vadd.f32 1.0, %v602_v16 }
 0x1af   : > { %v604_v18 = vpop.eup %603 }
 0x1b0   : > { %v278_v19 = vadd.f32 1.0, %v604_v18  ;;  %609 = vrcp.f32 %v277_v17 }
 0x1b1   : > { %v606_v20 = vpop.eup %605 }
 0x1b2   : > { %611 = vrcp.f32 %v278_v19  ;;  %v357_v21 = vadd.f32 1.0, %v606_v20 }
 0x1b3   : > { %v608_v22 = vpop.eup %607 }
 0x1b4   : > { %v358_v23 = vadd.f32 1.0, %v608_v22  ;;  %613 = vrcp.f32 %v357_v21 }
 0x1b6   : > { %615 = vrcp.f32 %v358_v23 }
 0x1ba   : > { %v610_v24 = vpop.eup %609 }
 0x1bc   : > { %v612_v25 = vpop.eup %611 }
 0x1bd   : > { %v285_v26 = vcombine.low %v610_v24, %v612_v25 }
 0x1be   : > { %v614_v27 = vpop.eup %613 }
 0x1bf   : > { %v287_v28 = vmul.f32 %v285_v26, %v958_v1 }
 0x1c0   : > { %v616_v29 = vpop.eup %615 }
 0x1c1   : > { %288 = vst [vmem:[%s199_s20] sm:$0xff] %v287_v28  ;;  %v365_v30 = vcombine.low %v614_v27, %v616_v29 }
 0x1c3   : > { %v367_v31 = vmul.f32 %v960_v2, %v365_v30 }
 0x1c5   : > { %368 = vst [vmem:[%s199_s20 + $0x8] sm:$0xff] %v367_v31 }
 0x1c6   : > { %688 = shalt.err (!%p685_p7)
}
 0x1c7   : > { %s689_s27 = scalar_lea.hbm %s986_s15, 256  ;;  %s693_s16 = scalar_lea.hbm %s1037_s2, 512 }
 0x1c8   : > { %p690_p13 = scmp.ne.s32.totalorder %s986_s15, %s689_s27  ;;  %p694_p12 = scmp.lt.u32.totalorder %s986_s15, %s1037_s2 }
 0x1c9   : > { %p695_p4 = scmp.lt.u32.totalorder %s693_s16, %s689_s27  ;;  %p697_p5 = scmp.lt.u32.totalorder %s689_s27, %s986_s15 }
 0x1ca   : > { %p691_p2 = pnand %p690_p13, %p1058_p10 }
 0x1cb   : > { %p696_p8 = por %p695_p4, %p694_p12 }
 0x1cc   : > { %p692_p6 = pneg %p691_p2 }
 0x1cd   : > { %p698_p11 = por %p697_p5, %p696_p8 }
 0x1cf   : > { %p699_p1 = pnand %p698_p11, %p692_p6 }
 0x1d1   : > { %702 = shalt.err (!%p699_p1)
}
 0x1d2   : > { %512 = dma.vmem_to_hbm [thread:$0]  (%p1058_p10), %s988_s23, 256, %s986_s15, %s370_s29  }
 0x1d3 PF: > { %s398_s3 = sand.u32 1, %s741_s9   ;;  %p1059_p0 = scmp.ne.s32.totalorder %s1048_s22, 0 }
 0x1d4   : > { %p1060_p9 = scmp.ge.s32.totalorder %s761_s14, 2  ;;  %s399_s4 = scalar_lea.sflag [#allocation4], %s398_s3 }
 0x1d6   : > { %p523_p3 = pnand %p1060_p9, %p1059_p0 }
 0x1d8   : > { %736 = dma.done.wait (!%p523_p3), %s399_s4, 256  }
 0x1d9   : > { %738 = vsyncadd (!%p523_p3), %s399_s4, 4294967040  ;;  %s19_s14 = sadd.s32 1, %s761_s14   ;;  %s1061_s9 = smov %s745_s10 }
 0x1da   : > { %p16_p7 = scmp.ge.s32.totalorder %s19_s14, 4   ;;  %s1062_s10 = smov %s749_s11 }
 0x1db   : > { %s1063_s11 = smov %s909_s25  ;;  %s1064_s12 = smov %s757_s13 }
 0x1dc   : > { %s1065_s13 = smov %s1067_s28  ;;  %18 = sbr.rel (!%p16_p7) target bundleno = 7 (0x7), region = 79 }
 0x1e3   :  { %404 = vsyncpa [#allocation3], 1 }
 0x1e4   :  { %406 = vsyncpa [#allocation3 + $0x1], 1 }
 0x1e5   :  { %407 = vsyncpa [#allocation6], 1 }
 0x1e6   :  { %408 = vsyncpa [#allocation4], 1 }
 0x1e7   :  { %410 = vsyncpa [#allocation4 + $0x1], 1 }

</bundles_post_ra>
